<compile_context>
chip_gen: v6e
topology: v6e:2x2x1
jax: 0.10.0
libtpu: 0.0.40
codegen_flags: <defaults>
</compile_context>

<pallas_src>
import functools

import jax
import jax.numpy as jnp
from jax.experimental import pallas as pl
from jax.experimental.pallas import tpu as pltpu


_SCAN_MIN_PAD = 8                       # prefix-sum path when pad >= 8 (k >= 17)
_LANE_TILE_MAX = 512                    # lanes per grid step (multiple of 128)
_VMEM_TILE_BUDGET = 20 * 1024 * 1024    # per-step sizing budget (fits all gens)
_VMEM_LIMIT_BYTES = 32 * 1024 * 1024    # raise v5e's 16 MiB default; OK on v6e/v7x


def _series_decomp_kernel(x_ref, res_ref, mean_ref, *, kernel_size):
    """One (L, TC) tile: time on sublanes, lane-dense channel tile on lanes."""
    pad = (kernel_size - 1) // 2
    x = x_ref[...]                                # (L, TC), input dtype
    xf = x.astype(jnp.float32)                    # cast hoisted out of the loop
    L, TC = xf.shape

    row = jax.lax.broadcasted_iota(jnp.int32, (L, TC), 0)
    x_first = jnp.broadcast_to(xf[0:1, :], (L, TC))
    x_last = jnp.broadcast_to(xf[L - 1:L, :], (L, TC))

    if pad >= _SCAN_MIN_PAD:
        # Difference of prefix sums: O(log L) rolls instead of k shifted adds.
        # (f32 prefix sums are plenty accurate for typical series lengths.)
        P = xf
        off = 1
        while off < L:
            P = P + jnp.where(row >= off, pltpu.roll(P, off, axis=0), 0.0)
            off *= 2
        P_last = jnp.broadcast_to(P[L - 1:L, :], (L, TC))
        upper = jnp.where(row >= L - pad, P_last,
                          pltpu.roll(P, (L - pad) % L, axis=0))
        lower = jnp.where(row >= pad + 1,
                          pltpu.roll(P, (pad + 1) % L, axis=0), 0.0)
        n_left = jnp.maximum(pad - row, 0).astype(jnp.float32)
        n_right = jnp.maximum(row - (L - 1 - pad), 0).astype(jnp.float32)
        acc = upper - lower + n_left * x_first + n_right * x_last
    else:
        # Small window: unrolled shifted adds.  pltpu.roll runs on the XLU
        # slot (overlaps the VALU adds); edge replication via jnp.where on the
        # row iota -- no sublane-misaligned concat buffer is materialized.
        acc = xf
        for d in range(1, pad + 1):
            fwd = jnp.where(row >= L - d, x_last,
                            pltpu.roll(xf, (L - d) % L, axis=0))
            bwd = jnp.where(row < d, x_first, pltpu.roll(xf, d, axis=0))
            acc = acc + fwd + bwd

    mean = acc * (1.0 / float(kernel_size))
    mean_out = mean.astype(mean_ref.dtype)
    mean_ref[...] = mean_out
    # Match the PyTorch module: res = x - moving_mean (mean already downcast).
    res_ref[...] = (x - mean_out.astype(x.dtype)).astype(res_ref.dtype)


def _folded_lane_tile(lane_extent, seq_len, itemsize):
    """Largest 128-multiple lane tile (<= _LANE_TILE_MAX) within the VMEM budget."""
    tc = min(_LANE_TILE_MAX, pl.cdiv(lane_extent, 128) * 128)
    per_lane = seq_len * (6 * itemsize + 24)   # in/out double-buffers + f32 temps
    while tc > 128 and tc * per_lane > _VMEM_TILE_BUDGET:
        tc -= 128
    return tc


def _aligned_lane_tile(channels, seq_len, itemsize):
    """Lane tile that divides C (C % 128 == 0) and fits the VMEM budget."""
    per_lane = seq_len * (6 * itemsize + 24)
    for tc in (512, 384, 256, 128):
        if channels % tc == 0 and tc * per_lane <= _VMEM_TILE_BUDGET:
            return tc
    return 128


def series_decomp(x, kernel_size):
    """Returns (res, moving_mean), both shaped like x = (B, L, C).

    Only odd kernel_size is supported (even kernels change the output length
    in the PyTorch reference) and (kernel_size - 1) // 2 must be < L.
    """
    B, L, C = x.shape
    assert kernel_size % 2 == 1, "only odd kernel_size supported"
    pad = (kernel_size - 1) // 2
    assert pad < L, "kernel_size too large for sequence length"
    # TODO(synk): very long sequences would want an L grid axis with a halo'd
    # input block; current tiles are sized for typical decomp lengths (<~2k).

    itemsize = jnp.dtype(x.dtype).itemsize
    kernel = functools.partial(_series_decomp_kernel, kernel_size=kernel_size)
    cost = pl.CostEstimate(flops=2 * kernel_size * B * L * C,
                           transcendentals=0,
                           bytes_accessed=3 * B * L * C * itemsize)

    if C % 128 == 0:
        # Lane-aligned channels: block directly, no transpose traffic.
        tc = _aligned_lane_tile(C, L, itemsize)
        block = pl.BlockSpec((None, L, tc), lambda b, j: (b, 0, j))
        res, mean = pl.pallas_call(
            kernel,
            out_shape=(jax.ShapeDtypeStruct((B, L, C), x.dtype),) * 2,
            grid=(B, C // tc),
            in_specs=[block],
            out_specs=(block, block),
            compiler_params=pltpu.CompilerParams(
                dimension_semantics=("parallel", "parallel"),
                vmem_limit_bytes=_VMEM_LIMIT_BYTES),
            cost_estimate=cost,
        )(x)
        return res, mean

    # Small / unaligned C: fold channels with batch on the lane axis so stores
    # are full-lane (unmasked), and pad lanes up to the tile size.
    N = B * C
    tc = _folded_lane_tile(N, L, itemsize)
    n_pad = pl.cdiv(N, tc) * tc
    xt = jnp.transpose(x, (1, 0, 2)).reshape(L, N)
    if n_pad != N:
        xt = jnp.pad(xt, ((0, 0), (0, n_pad - N)))

    block = pl.BlockSpec((L, tc), lambda j: (0, j))
    res_f, mean_f = pl.pallas_call(
        kernel,
        out_shape=(jax.ShapeDtypeStruct((L, n_pad), x.dtype),) * 2,
        grid=(n_pad // tc,),
        in_specs=[block],
        out_specs=(block, block),
        compiler_params=pltpu.CompilerParams(
            dimension_semantics=("parallel",),
            vmem_limit_bytes=_VMEM_LIMIT_BYTES),
        cost_estimate=cost,
    )(xt)

    def unfold(y):
        return jnp.transpose(y[:, :N].reshape(L, B, C), (1, 0, 2))

    return unfold(res_f), unfold(mean_f)


def _series_decomp_ref(x, kernel_size):
    pad = (kernel_size - 1) // 2
    front = jnp.repeat(x[:, 0:1, :], pad, axis=1)
    end = jnp.repeat(x[:, -1:, :], pad, axis=1)
    xp = jnp.concatenate([front, x, end], axis=1).astype(jnp.float32)
    B, L, C = x.shape
    acc = jnp.zeros((B, L, C), jnp.float32)
    for j in range(kernel_size):
        acc = acc + xp[:, j:j + L, :]
    mean = (acc / kernel_size).astype(x.dtype)
    return x - mean, mean


if __name__ == "__main__":
    key = jax.random.PRNGKey(0)
    k0, k1, k2 = jax.random.split(key, 3)

    def check(B, L, C, ks, subkey):
        x = jax.random.normal(subkey, (B, L, C), dtype=jnp.float32)
        res, mean = series_decomp(x, ks)
        jax.block_until_ready((res, mean))
        res_ref, mean_ref = _series_decomp_ref(x, ks)
        assert res.shape == x.shape and mean.shape == x.shape
        assert jnp.allclose(mean, mean_ref, atol=1e-4, rtol=1e-4)
        assert jnp.allclose(res, res_ref, atol=1e-4, rtol=1e-4)

    check(2, 16, 8, 5, k0)      # small C  -> folded lane-dense path, unrolled window
    check(2, 32, 8, 25, k1)     # large k  -> prefix-sum (scan) path
    check(2, 16, 256, 5, k2)    # aligned C -> direct (batch, C-tile) grid path

    print("KERNEL_OK")
</pallas_src>

<mosaic_0001>
module attributes {stable_mosaic.version = 11 : i64} {
  func.func @_series_decomp_kernel(%arg0: i32, %arg1: memref<16x128xf32, #tpu.memory_space<vmem>>, %arg2: memref<16x128xf32, #tpu.memory_space<vmem>>, %arg3: memref<16x128xf32, #tpu.memory_space<vmem>>) attributes {dimension_semantics = [#tpu.dimension_semantics<parallel>], iteration_bounds = array<i64: 1>, scalar_prefetch = 0 : i64, scratch_operands = 0 : i64, tpu.core_type = #tpu.core_type<tc>, window_params = [{transform_indices = @transform_0, window_bounds = array<i64: 16, 128>}, {transform_indices = @transform_1, window_bounds = array<i64: 16, 128>}, {transform_indices = @transform_2, window_bounds = array<i64: 16, 128>}]} {
    %c0 = arith.constant 0 : index
    %c0_0 = arith.constant 0 : index
    %0 = vector.load %arg1[%c0, %c0_0] : memref<16x128xf32, #tpu.memory_space<vmem>>, vector<16x128xf32>
    %1 = tpu.iota {dimensions = array<i32: 0>} : vector<16x128xi32>
    %2 = vector.extract_strided_slice %0 {offsets = [0, 0], sizes = [1, 128], strides = [1, 1]} : vector<16x128xf32> to vector<1x128xf32>
    %3 = vector.shape_cast %2 : vector<1x128xf32> to vector<1x128xf32>
    %4 = vector.broadcast %3 : vector<1x128xf32> to vector<16x128xf32>
    %5 = vector.extract_strided_slice %0 {offsets = [15, 0], sizes = [1, 128], strides = [1, 1]} : vector<16x128xf32> to vector<1x128xf32>
    %6 = vector.shape_cast %5 : vector<1x128xf32> to vector<1x128xf32>
    %7 = vector.broadcast %6 : vector<1x128xf32> to vector<16x128xf32>
    %c15_i32 = arith.constant 15 : i32
    %8 = vector.broadcast %c15_i32 : i32 to vector<16x128xi32>
    %9 = arith.cmpi sge, %1, %8 : vector<16x128xi32>
    %c15_i32_1 = arith.constant 15 : i32
    %10 = tpu.dynamic_rotate %0 by %c15_i32_1 dim 0 : vector<16x128xf32>, i32 -> vector<16x128xf32>
    %11 = arith.select %9, %7, %10 : vector<16x128xi1>, vector<16x128xf32>
    %c1_i32 = arith.constant 1 : i32
    %12 = vector.broadcast %c1_i32 : i32 to vector<16x128xi32>
    %13 = arith.cmpi slt, %1, %12 : vector<16x128xi32>
    %c1_i32_2 = arith.constant 1 : i32
    %14 = tpu.dynamic_rotate %0 by %c1_i32_2 dim 0 : vector<16x128xf32>, i32 -> vector<16x128xf32>
    %15 = arith.select %13, %4, %14 : vector<16x128xi1>, vector<16x128xf32>
    %16 = arith.addf %0, %11 : vector<16x128xf32>
    %17 = arith.addf %16, %15 : vector<16x128xf32>
    %c14_i32 = arith.constant 14 : i32
    %18 = vector.broadcast %c14_i32 : i32 to vector<16x128xi32>
    %19 = arith.cmpi sge, %1, %18 : vector<16x128xi32>
    %c14_i32_3 = arith.constant 14 : i32
    %20 = tpu.dynamic_rotate %0 by %c14_i32_3 dim 0 : vector<16x128xf32>, i32 -> vector<16x128xf32>
    %21 = arith.select %19, %7, %20 : vector<16x128xi1>, vector<16x128xf32>
    %c2_i32 = arith.constant 2 : i32
    %22 = vector.broadcast %c2_i32 : i32 to vector<16x128xi32>
    %23 = arith.cmpi slt, %1, %22 : vector<16x128xi32>
    %c2_i32_4 = arith.constant 2 : i32
    %24 = tpu.dynamic_rotate %0 by %c2_i32_4 dim 0 : vector<16x128xf32>, i32 -> vector<16x128xf32>
    %25 = arith.select %23, %4, %24 : vector<16x128xi1>, vector<16x128xf32>
    %26 = arith.addf %17, %21 : vector<16x128xf32>
    %27 = arith.addf %26, %25 : vector<16x128xf32>
    %cst = arith.constant 2.000000e-01 : f32
    %28 = vector.broadcast %cst : f32 to vector<16x128xf32>
    %29 = arith.mulf %27, %28 : vector<16x128xf32>
    %c0_5 = arith.constant 0 : index
    %c0_6 = arith.constant 0 : index
    %30 = vector.load %arg3[%c0_5, %c0_6] : memref<16x128xf32, #tpu.memory_space<vmem>>, vector<16x128xf32>
    tpu.vector_store %arg3[%c0_5, %c0_6], %29 {strides = array<i32>} : memref<16x128xf32, #tpu.memory_space<vmem>>, vector<16x128xf32>,
    %31 = arith.subf %0, %29 : vector<16x128xf32>
    %c0_7 = arith.constant 0 : index
    %c0_8 = arith.constant 0 : index
    %32 = vector.load %arg2[%c0_7, %c0_8] : memref<16x128xf32, #tpu.memory_space<vmem>>, vector<16x128xf32>
    tpu.vector_store %arg2[%c0_7, %c0_8], %31 {strides = array<i32>} : memref<16x128xf32, #tpu.memory_space<vmem>>, vector<16x128xf32>,
    return
  }
  func.func @transform_0(%arg0: i32) -> (i32, i32) {
    %c0_i32 = arith.constant 0 : i32
    %c0_i32_0 = arith.constant 0 : i32
    return %c0_i32, %arg0 : i32, i32
  }
  func.func @transform_1(%arg0: i32) -> (i32, i32) {
    %c0_i32 = arith.constant 0 : i32
    %c0_i32_0 = arith.constant 0 : i32
    return %c0_i32, %arg0 : i32, i32
  }
  func.func @transform_2(%arg0: i32) -> (i32, i32) {
    %c0_i32 = arith.constant 0 : i32
    %c0_i32_0 = arith.constant 0 : i32
    return %c0_i32, %arg0 : i32, i32
  }
}

</mosaic_0001>

<bundles_post_ra>
// kernel: tpu_custom_call.1
= control target key start
LH: loop header
LB: loop body
LE: loop exit
PB: predicated region body
PF: predicated region fallthrough
CT: control target
= control target key end

     0   :  { %8 = vsyncpa [#allocation3], 0  ;;  %s243_s0 = inlined_call_operand.hbm [shape: f32[16,128], index: 0, kind: input, shape index: {}]   ;;  %s244_s1 = inlined_call_operand.hbm [shape: f32[16,128], index: 1, kind: output, shape index: {0}]   ;;  %s245_s2 = inlined_call_operand.hbm [shape: f32[16,128], index: 2, kind: output, shape index: {1}]  }
   0x1   :  { %9 = vsyncpa [#allocation4], 0 }
   0x2   :  { %10 = vsyncpa [#allocation7], 0  ;;  %s193_s9 = smov [#allocation2]  }
   0x3   :  { %s16_s10 = sshll.u32 %s193_s9, 4  ;;  %s17_s10 = int_to_ptr.vmem [resolvable:$true] %s16_s10 }
   0x4   :  { %s135_s11 = scalar_lea.vmem %s17_s10, 256  ;;  %p140_p1 = scmp.lt.s32.totalorder %s17_s10, %s17_s10 }
   0x5   :  { %p136_p0 = scmp.ne.s32.totalorder %s17_s10, %s135_s11  ;;  %p141_p2 = scmp.lt.s32.totalorder %s135_s11, %s135_s11 }
   0x7   :  { %p142_p3 = por %p141_p2, %p140_p1 }
   0x9   :  { %p143_p4 = pnand %p142_p3, %p136_p0 }
   0xb   :  { %146 = shalt.err (!%p143_p4)
}
   0xc   :  { %s194_s12 = smov 128   ;;  %s195_s13 = smov 8  }
   0xd   :  { %22 = dma.hbm_to_vmem [thread:$0]  %s243_s0, 256, %s17_s10, [#allocation3], %s194_s12, %s194_s12, %s195_s13  }
   0xe   :  { %187 = dma.done.wait [#allocation3], 256  }
   0xf   :  { %188 = vsyncadd [#allocation3], 4294967040  ;;  %v28_v0 = vlaneseq  ;;  %v26_v5 = vld [vmem:[#allocation2] sm:$0xff]  ;;  %v27_v6 = vld [vmem:[#allocation2 + $0x8] sm:$0xff]  ;;  %s196_s0 = smov [#allocation6]   ;;  %s197_s17 = smov [#allocation5]  }
  0x10   :  { %v41_v8 = vrot.slane %v26_v5, 1  ;;  %v42_v9 = vrot.slane %v27_v6, 1  ;;  %v50_v10 = vrot.slane %v26_v5, 7  ;;  %v51_v11 = vrot.slane %v27_v6, 7  ;;  %s106_s16 = sshll.u32 %s196_s0, 4  ;;  %s94_s18 = sshll.u32 %s197_s17, 4  ;;  %s107_s16 = int_to_ptr.vmem [resolvable:$true] %s106_s16  ;;  %s95_s18 = int_to_ptr.vmem [resolvable:$true] %s94_s18 }
  0x11   :  { %v29_v1 = vshrl.u32 %v28_v0, 7  ;;  %v62_v12 = vrot.slane %v26_v5, 2  ;;  %v63_v13 = vrot.slane %v27_v6, 2  ;;  %v71_v14 = vrot.slane %v26_v5, 6  ;;  %s147_s19 = scalar_lea.vmem %s107_s16, 256  ;;  %p152_p6 = scmp.lt.s32.totalorder %s107_s16, %s107_s16 }
  0x12   :  { %v72_v16 = vrot.slane %v27_v6, 6  ;;  %p148_p5 = scmp.ne.s32.totalorder %s107_s16, %s147_s19  ;;  %p153_p7 = scmp.lt.s32.totalorder %s147_s19, %s147_s19 }
  0x13   :  { %v33_v2 = vsub.s32 0, %v29_v1  ;;  %v30_v3 = vadd.s32 8, %v29_v1  ;;  %vm43_vm0 = vcmp.lt.s32.totalorder %v29_v1, 7  ;;  %vm48_vm1 = vcmp.lt.s32.totalorder %v29_v1, 1 }
  0x14   :  { %v37_v4 = vsub.s32 7, %v29_v1  ;;  %vm64_vm2 = vcmp.lt.s32.totalorder %v29_v1, 6  ;;  %vm69_vm3 = vcmp.lt.s32.totalorder %v29_v1, 2  ;;  %v44_v15 = vsel %vm43_vm0, %v41_v8, %v42_v9  ;;  %p154_p8 = por %p153_p7, %p152_p6 }
  0x15   :  { %vm40_vm4 = vcmp.ge.s32.totalorder %v30_v3, 15  ;;  %vm61_vm5 = vcmp.ge.s32.totalorder %v30_v3, 14  ;;  %v34_v7 = vrot.slane %v26_v5, %v33_v2  ;;  %v45_v18 = vsel %vm43_vm0, %v42_v9, %v41_v8 }
  0x16   :  { %v38_v17 = vrot.slane %v27_v6, %v37_v4  ;;  %v53_v19 = vsel %vm48_vm1, %v51_v11, %v50_v10  ;;  %v56_v20 = vadd.f32 %v44_v15, %v26_v5  ;;  %v65_v21 = vsel %vm64_vm2, %v62_v12, %v63_v13  ;;  %p155_p9 = pnand %p154_p8, %p148_p5 }
  0x17   :  { %v52_v22 = vsel %vm48_vm1, %v50_v10, %v51_v11  ;;  %v54_v23 = vsel %vm48_vm1, %v34_v7, %v53_v19  ;;  %v74_v24 = vsel %vm69_vm3, %v72_v16, %v71_v14  ;;  %v66_v26 = vsel %vm64_vm2, %v63_v13, %v62_v12 }
  0x18   :  { %v47_v25 = vsel %vm40_vm4, %v38_v17, %v45_v18  ;;  %v58_v27 = vadd.f32 %v56_v20, %v54_v23  ;;  %v75_v29 = vsel %vm69_vm3, %v34_v7, %v74_v24  ;;  %v68_v30 = vsel %vm61_vm5, %v38_v17, %v66_v26 }
  0x19   :  { %v57_v28 = vadd.f32 %v47_v25, %v27_v6  ;;  %v73_v33 = vsel %vm69_vm3, %v71_v14, %v72_v16 }
  0x1a   :  { %v77_v31 = vadd.f32 %v65_v21, %v58_v27 }
  0x1b   :  { %v59_v32 = vadd.f32 %v57_v28, %v52_v22 }
  0x1c   :  { %v79_v34 = vadd.f32 %v77_v31, %v75_v29 }
  0x1d   :  { %v78_v35 = vadd.f32 %v68_v30, %v59_v32 }
  0x1e   :  { %v81_v36 = vmul.f32 0.2, %v79_v34 }
  0x1f   :  { %v80_v37 = vadd.f32 %v78_v35, %v73_v33 }
  0x20   :  { %83 = vst [vmem:[#allocation6] sm:$0xff] %v81_v36  ;;  %v85_v39 = vsub.f32 %v26_v5, %v81_v36 }
  0x21   :  { %v82_v38 = vmul.f32 0.2, %v80_v37 }
  0x22   :  { %87 = vst [vmem:[#allocation5] sm:$0xff] %v85_v39 }
  0x23   :  { %84 = vst [vmem:[#allocation6 + $0x8] sm:$0xff] %v82_v38  ;;  %v86_v40 = vsub.f32 %v27_v6, %v82_v38 }
  0x24   :  { %158 = shalt.err (!%p155_p9)
}
  0x25   :  { %112 = dma.vmem_to_hbm [thread:$0]  %s107_s16, 256, %s245_s2, [#allocation7], %s194_s12, %s194_s12, %s195_s13   ;;  %88 = vst [vmem:[#allocation5 + $0x8] sm:$0xff] %v86_v40 }
  0x26   :  { %s167_s22 = scalar_lea.vmem %s95_s18, 256  ;;  %p172_p11 = scmp.lt.s32.totalorder %s95_s18, %s95_s18 }
  0x27   :  { %p168_p10 = scmp.ne.s32.totalorder %s95_s18, %s167_s22  ;;  %p173_p12 = scmp.lt.s32.totalorder %s167_s22, %s167_s22 }
  0x29   :  { %p174_p13 = por %p173_p12, %p172_p11 }
  0x2b   :  { %p175_p0 = pnand %p174_p13, %p168_p10 }
  0x2d   :  { %178 = shalt.err (!%p175_p0)
}
  0x2e   :  { %100 = dma.vmem_to_hbm [thread:$0]  %s95_s18, 256, %s244_s1, [#allocation4], %s194_s12, %s194_s12, %s195_s13  }
  0x2f   :  { %189 = dma.done.wait [#allocation4], 256  }
  0x30   :  { %190 = vsyncadd [#allocation4], 4294967040 }
  0x31   :  { %191 = dma.done.wait [#allocation7], 256  }
  0x32   :  { %192 = vsyncadd [#allocation7], 4294967040 }
  0x33   :  { %119 = vsyncpa [#allocation3], 1 }
  0x34   :  { %120 = vsyncpa [#allocation4], 1 }
  0x35   :  { %121 = vsyncpa [#allocation7], 1 }

</bundles_post_ra>
